<compile_context>
chip_gen: v7x
topology: tpu7x:2x2x1
jax: 0.10.0
libtpu: 0.0.40
codegen_flags: <defaults>
</compile_context>

<pallas_src>
import functools

import jax
import jax.numpy as jnp
from jax.experimental import pallas as pl
from jax.experimental.pallas import tpu as pltpu


# ----------------------------------------------------------------------------
# Kernels
# ----------------------------------------------------------------------------
def _shuffle_up_kernel(x_ref, r_ref, o_ref, *, r):
    """PixelShuffle (upscale by integer r) for one batch image.

    x_ref: (C_out, r*r, H, W)     -- free view of the NCHW input image
    r_ref: (r*r, W, r*W*r)        -- 0/1 lane-interleave matrices, one per (dy, dx)
    o_ref: (C_out*H, r*W*r)       -- free view of the NCHW output image
    """
    c_out, _, H, W = x_ref.shape
    acc = jnp.zeros(o_ref.shape, jnp.float32)
    for k in range(r * r):                        # static unroll, r is tiny
        plane = x_ref[:, k, :, :].reshape(c_out * H, W)
        acc = acc + jnp.dot(plane, r_ref[k],
                            preferred_element_type=jnp.float32)
    o_ref[...] = acc.astype(o_ref.dtype)          # single lane-dense full store


def _shuffle_down_kernel(x_ref, s_ref, o_ref, *, b):
    """PixelShuffle (downscale, block size b = 1/scale) for one batch image.

    x_ref: (C*H_out, b*W_in)      -- free view of the NCHW input image
    s_ref: (b*b, b*W_in, W_out)   -- 0/1 de-interleave matrices, one per (by, bx)
    o_ref: (C, b*b, H_out, W_out) -- free view of the NCHW output image
    """
    C, _, h_out, w_out = o_ref.shape
    x = x_ref[...]                                # load once, reuse for all phases
    for k in range(b * b):                        # static unroll
        contrib = jnp.dot(x, s_ref[k], preferred_element_type=jnp.float32)
        o_ref[:, k, :, :] = contrib.reshape(C, h_out, w_out).astype(o_ref.dtype)


# ----------------------------------------------------------------------------
# 0/1 permutation-matrix builders (host-side constants)
# ----------------------------------------------------------------------------
def _upscale_mats(r, W, dtype):
    w = jnp.arange(W)
    mats = []
    for dy in range(r):
        for dx in range(r):
            cols = dy * (W * r) + w * r + dx
            mats.append(jnp.zeros((W, r * W * r), dtype).at[w, cols].set(1))
    return jnp.stack(mats)                        # (r*r, W, r*W*r)


def _downscale_mats(b, W_in, dtype):
    W_out = W_in // b
    w = jnp.arange(W_out)
    mats = []
    for by in range(b):
        for bx in range(b):
            rows = by * W_in + w * b + bx
            mats.append(jnp.zeros((b * W_in, W_out), dtype).at[rows, w].set(1))
    return jnp.stack(mats)                        # (b*b, b*W_in, W_out)


# ----------------------------------------------------------------------------
# Public wrapper: torch pixel_shuffle semantics on an NCHW array
# ----------------------------------------------------------------------------
def pixel_shuffle_pallas(x, scale_factor):
    N, C, H, W = x.shape
    if scale_factor >= 1:
        r = int(scale_factor)
        assert C % (r * r) == 0
        c_out = C // (r * r)
        x_v = x.reshape(N, c_out, r * r, H, W)                 # free view
        R = _upscale_mats(r, W, jnp.float32)
        kern = functools.partial(_shuffle_up_kernel, r=r)
        out = pl.pallas_call(
            kern,
            out_shape=jax.ShapeDtypeStruct((N, c_out * H, r * W * r), x.dtype),
            grid=(N,),
            in_specs=[
                pl.BlockSpec((None, c_out, r * r, H, W),
                             lambda n: (n, 0, 0, 0, 0)),
                pl.BlockSpec((r * r, W, r * W * r), lambda n: (0, 0, 0)),
            ],
            out_specs=pl.BlockSpec((None, c_out * H, r * W * r),
                                   lambda n: (n, 0, 0)),
            compiler_params=pltpu.CompilerParams(
                dimension_semantics=("parallel",)),
        )(x_v, R)
        return out.reshape(N, c_out, H * r, W * r)             # free view
    else:
        b = int(round(1.0 / scale_factor))
        assert H % b == 0 and W % b == 0
        h_out, w_out = H // b, W // b
        x_v = x.reshape(N, C * h_out, b * W)                   # free view
        S = _downscale_mats(b, W, jnp.float32)
        kern = functools.partial(_shuffle_down_kernel, b=b)
        out = pl.pallas_call(
            kern,
            out_shape=jax.ShapeDtypeStruct((N, C, b * b, h_out, w_out), x.dtype),
            grid=(N,),
            in_specs=[
                pl.BlockSpec((None, C * h_out, b * W), lambda n: (n, 0, 0)),
                pl.BlockSpec((b * b, b * W, w_out), lambda n: (0, 0, 0)),
            ],
            out_specs=pl.BlockSpec((None, C, b * b, h_out, w_out),
                                   lambda n: (n, 0, 0, 0, 0)),
            compiler_params=pltpu.CompilerParams(
                dimension_semantics=("parallel",)),
        )(x_v, S)
        return out.reshape(N, C * b * b, h_out, w_out)         # free view


# ----------------------------------------------------------------------------
# Pure-JAX mirror of the PyTorch reference pixel_shuffle()
# ----------------------------------------------------------------------------
def _pixel_shuffle_ref(x, scale_factor):
    N, C, H, W = x.shape
    if scale_factor >= 1:
        r = int(scale_factor)
        c_out = C // (r * r)
        v = x.reshape(N, c_out, r, r, H, W)
        return jnp.transpose(v, (0, 1, 4, 2, 5, 3)).reshape(N, c_out, H * r, W * r)
    b = int(round(1.0 / scale_factor))
    h_out, w_out = H // b, W // b
    v = x.reshape(N, C, h_out, b, w_out, b)
    return jnp.transpose(v, (0, 1, 3, 5, 2, 4)).reshape(N, C * b * b, h_out, w_out)


# ----------------------------------------------------------------------------
if __name__ == "__main__":
    key = jax.random.PRNGKey(0)
    x = jax.random.uniform(key, (2, 4, 16, 16), jnp.float32)

    # scale_factor >= 1 branch (PixelShuffle(2))
    up = jax.jit(functools.partial(pixel_shuffle_pallas, scale_factor=2))
    y = jax.block_until_ready(up(x))
    y_ref = _pixel_shuffle_ref(x, 2)
    assert y.shape == (2, 1, 32, 32), y.shape
    assert bool(jnp.all(jnp.isfinite(y)))
    err_up = float(jnp.max(jnp.abs(y - y_ref)))
    assert err_up < 5e-3, err_up

    # scale_factor < 1 branch (pixel-unshuffle); inverts the upscale.
    down = jax.jit(functools.partial(pixel_shuffle_pallas, scale_factor=0.5))
    z = jax.block_until_ready(down(y_ref))
    z_ref = _pixel_shuffle_ref(y_ref, 0.5)
    assert z.shape == (2, 4, 16, 16), z.shape
    err_down = float(jnp.max(jnp.abs(z - z_ref)))
    assert err_down < 5e-3, err_down
    assert float(jnp.max(jnp.abs(z_ref - x))) == 0.0   # round-trip sanity

    print("KERNEL_OK")
</pallas_src>

<mosaic_0001>
module attributes {stable_mosaic.version = 11 : i64} {
  func.func @_shuffle_up_kernel(%arg0: i32, %arg1: memref<1x1x4x16x16xf32, #tpu.memory_space<vmem>>, %arg2: memref<4x16x64xf32, #tpu.memory_space<vmem>>, %arg3: memref<1x16x64xf32, #tpu.memory_space<vmem>>) attributes {dimension_semantics = [#tpu.dimension_semantics<parallel>], iteration_bounds = array<i64: 2>, scalar_prefetch = 0 : i64, scratch_operands = 0 : i64, tpu.core_type = #tpu.core_type<tc>, window_params = [{transform_indices = @transform_0, window_bounds = array<i64: 1, 1, 4, 16, 16>}, {pipeline_mode = #tpu.pipeline_mode<synchronous>, transform_indices = @transform_1, window_bounds = array<i64: 4, 16, 64>}, {transform_indices = @transform_2, window_bounds = array<i64: 1, 16, 64>}]} {
    %cst = arith.constant 0.000000e+00 : f32
    %0 = vector.broadcast %cst : f32 to vector<16x64xf32>
    %c0 = arith.constant 0 : index
    %c0_0 = arith.constant 0 : index
    %c0_1 = arith.constant 0 : index
    %c0_2 = arith.constant 0 : index
    %c0_3 = arith.constant 0 : index
    %1 = vector.load %arg1[%c0, %c0_0, %c0_1, %c0_2, %c0_3] : memref<1x1x4x16x16xf32, #tpu.memory_space<vmem>>, vector<1x1x1x16x16xf32>
    %2 = vector.shape_cast %1 : vector<1x1x1x16x16xf32> to vector<1x16x16xf32>
    %3 = vector.shape_cast %2 : vector<1x16x16xf32> to vector<16x16xf32>
    %c0_4 = arith.constant 0 : index
    %c0_5 = arith.constant 0 : index
    %c0_6 = arith.constant 0 : index
    %4 = vector.load %arg2[%c0_4, %c0_5, %c0_6] : memref<4x16x64xf32, #tpu.memory_space<vmem>>, vector<1x16x64xf32>
    %5 = vector.shape_cast %4 : vector<1x16x64xf32> to vector<16x64xf32>
    %cst_7 = arith.constant dense<0.000000e+00> : vector<16x64xf32>
    %6 = tpu.matmul %3, %5, %cst_7 {dimension_numbers = #tpu.dot_dimension_numbers<[1], [0], [0], [1], [0, 0, 1, 1], [], []>} : vector<16x16xf32>, vector<16x64xf32>, vector<16x64xf32> -> vector<16x64xf32>
    %7 = arith.addf %0, %6 : vector<16x64xf32>
    %c0_8 = arith.constant 0 : index
    %c0_9 = arith.constant 0 : index
    %c1 = arith.constant 1 : index
    %c0_10 = arith.constant 0 : index
    %c0_11 = arith.constant 0 : index
    %8 = vector.load %arg1[%c0_8, %c0_9, %c1, %c0_10, %c0_11] : memref<1x1x4x16x16xf32, #tpu.memory_space<vmem>>, vector<1x1x1x16x16xf32>
    %9 = vector.shape_cast %8 : vector<1x1x1x16x16xf32> to vector<1x16x16xf32>
    %10 = vector.shape_cast %9 : vector<1x16x16xf32> to vector<16x16xf32>
    %c1_12 = arith.constant 1 : index
    %c0_13 = arith.constant 0 : index
    %c0_14 = arith.constant 0 : index
    %11 = vector.load %arg2[%c1_12, %c0_13, %c0_14] : memref<4x16x64xf32, #tpu.memory_space<vmem>>, vector<1x16x64xf32>
    %12 = vector.shape_cast %11 : vector<1x16x64xf32> to vector<16x64xf32>
    %cst_15 = arith.constant dense<0.000000e+00> : vector<16x64xf32>
    %13 = tpu.matmul %10, %12, %cst_15 {dimension_numbers = #tpu.dot_dimension_numbers<[1], [0], [0], [1], [0, 0, 1, 1], [], []>} : vector<16x16xf32>, vector<16x64xf32>, vector<16x64xf32> -> vector<16x64xf32>
    %14 = arith.addf %7, %13 : vector<16x64xf32>
    %c0_16 = arith.constant 0 : index
    %c0_17 = arith.constant 0 : index
    %c2 = arith.constant 2 : index
    %c0_18 = arith.constant 0 : index
    %c0_19 = arith.constant 0 : index
    %15 = vector.load %arg1[%c0_16, %c0_17, %c2, %c0_18, %c0_19] : memref<1x1x4x16x16xf32, #tpu.memory_space<vmem>>, vector<1x1x1x16x16xf32>
    %16 = vector.shape_cast %15 : vector<1x1x1x16x16xf32> to vector<1x16x16xf32>
    %17 = vector.shape_cast %16 : vector<1x16x16xf32> to vector<16x16xf32>
    %c2_20 = arith.constant 2 : index
    %c0_21 = arith.constant 0 : index
    %c0_22 = arith.constant 0 : index
    %18 = vector.load %arg2[%c2_20, %c0_21, %c0_22] : memref<4x16x64xf32, #tpu.memory_space<vmem>>, vector<1x16x64xf32>
    %19 = vector.shape_cast %18 : vector<1x16x64xf32> to vector<16x64xf32>
    %cst_23 = arith.constant dense<0.000000e+00> : vector<16x64xf32>
    %20 = tpu.matmul %17, %19, %cst_23 {dimension_numbers = #tpu.dot_dimension_numbers<[1], [0], [0], [1], [0, 0, 1, 1], [], []>} : vector<16x16xf32>, vector<16x64xf32>, vector<16x64xf32> -> vector<16x64xf32>
    %21 = arith.addf %14, %20 : vector<16x64xf32>
    %c0_24 = arith.constant 0 : index
    %c0_25 = arith.constant 0 : index
    %c3 = arith.constant 3 : index
    %c0_26 = arith.constant 0 : index
    %c0_27 = arith.constant 0 : index
    %22 = vector.load %arg1[%c0_24, %c0_25, %c3, %c0_26, %c0_27] : memref<1x1x4x16x16xf32, #tpu.memory_space<vmem>>, vector<1x1x1x16x16xf32>
    %23 = vector.shape_cast %22 : vector<1x1x1x16x16xf32> to vector<1x16x16xf32>
    %24 = vector.shape_cast %23 : vector<1x16x16xf32> to vector<16x16xf32>
    %c3_28 = arith.constant 3 : index
    %c0_29 = arith.constant 0 : index
    %c0_30 = arith.constant 0 : index
    %25 = vector.load %arg2[%c3_28, %c0_29, %c0_30] : memref<4x16x64xf32, #tpu.memory_space<vmem>>, vector<1x16x64xf32>
    %26 = vector.shape_cast %25 : vector<1x16x64xf32> to vector<16x64xf32>
    %cst_31 = arith.constant dense<0.000000e+00> : vector<16x64xf32>
    %27 = tpu.matmul %24, %26, %cst_31 {dimension_numbers = #tpu.dot_dimension_numbers<[1], [0], [0], [1], [0, 0, 1, 1], [], []>} : vector<16x16xf32>, vector<16x64xf32>, vector<16x64xf32> -> vector<16x64xf32>
    %28 = arith.addf %21, %27 : vector<16x64xf32>
    %c0_32 = arith.constant 0 : index
    %c0_33 = arith.constant 0 : index
    %c0_34 = arith.constant 0 : index
    %29 = vector.load %arg3[%c0_32, %c0_33, %c0_34] : memref<1x16x64xf32, #tpu.memory_space<vmem>>, vector<1x16x64xf32>
    %30 = vector.shape_cast %29 : vector<1x16x64xf32> to vector<16x64xf32>
    %31 = vector.shape_cast %28 : vector<16x64xf32> to vector<1x16x64xf32>
    tpu.vector_store %arg3[%c0_32, %c0_33, %c0_34], %31 {strides = array<i32>} : memref<1x16x64xf32, #tpu.memory_space<vmem>>, vector<1x16x64xf32>,
    return
  }
  func.func @transform_0(%arg0: i32) -> (i32, i32, i32, i32, i32) {
    %c0_i32 = arith.constant 0 : i32
    %c0_i32_0 = arith.constant 0 : i32
    %c0_i32_1 = arith.constant 0 : i32
    %c0_i32_2 = arith.constant 0 : i32
    %c0_i32_3 = arith.constant 0 : i32
    return %arg0, %c0_i32, %c0_i32_0, %c0_i32_1, %c0_i32_2 : i32, i32, i32, i32, i32
  }
  func.func @transform_1(%arg0: i32) -> (i32, i32, i32) {
    %c0_i32 = arith.constant 0 : i32
    %c0_i32_0 = arith.constant 0 : i32
    %c0_i32_1 = arith.constant 0 : i32
    %c0_i32_2 = arith.constant 0 : i32
    return %c0_i32, %c0_i32_0, %c0_i32_1 : i32, i32, i32
  }
  func.func @transform_2(%arg0: i32) -> (i32, i32, i32) {
    %c0_i32 = arith.constant 0 : i32
    %c0_i32_0 = arith.constant 0 : i32
    %c0_i32_1 = arith.constant 0 : i32
    return %arg0, %c0_i32, %c0_i32_0 : i32, i32, i32
  }
}

</mosaic_0001>

<bundles_post_ra>
// kernel: pixel_shuffle_pallas.1
= control target key start
LH: loop header
LB: loop body
LE: loop exit
PB: predicated region body
PF: predicated region fallthrough
CT: control target
= control target key end

     0   :  { %s683_s9 = smov 0   ;;  %s736_s0 = inlined_call_operand.vmem [shape: f32[2,1,4,16,16], index: 0, kind: input, shape index: {}]   ;;  %s737_s1 = inlined_call_operand.vmem [shape: f32[4,16,64], index: 1, kind: input, shape index: {}]   ;;  %s738_s2 = inlined_call_operand.vmem [shape: f32[2,16,64], index: 2, kind: output, shape index: {}]  }
   0x1 LB: > { %s553_s10 = sadd.s32 4294967295, %s666_s9   ;;  %p557_p0 = scmp.ge.s32.totalorder %s666_s9, 1  ;;  %s666_s9 = sphi %s683_s9, %s12_s9  }
   0x2   : > { %p112_p1 = scmp.lt.s32.totalorder %s666_s9, 3 }
   0x4   : > { %p113_p2 = pnand %p557_p0, %p112_p1 }
   0x5   : > { %v564_v0 = vld [vmem:[%s737_s1 + $0x10] sm:$0xff] (!%p113_p2)  ;;  %v565_v1 = vld [vmem:[%s737_s1 + $0x18] sm:$0xff] (!%p113_p2)  ;;  %v572_v2 = vld [vmem:[%s737_s1 + $0x20] sm:$0xff] (!%p113_p2)  ;;  %p134_p3 = scmp.lt.s32.totalorder (!%p113_p2), %s553_s10, 1  ;;  %vm154_vm0 = vcmask (!%p113_p2), 130048   ;;  %vm495_vm1 = vcmask (!%p113_p2), 523264  }
   0x6   : > { %116 = sbr.rel (%p113_p2) target bundleno = 242 (0xf2), region = 28  ;;  %v630_v3 = vpack.c.bf16 (!%p113_p2), %v565_v1, %v564_v0  ;;  %v573_v4 = vld [vmem:[%s737_s1 + $0x28] sm:$0xff] (!%p113_p2)  ;;  %v146_v5 = vld [vmem:[%s737_s1] sm:$0xff] (!%p113_p2)  ;;  %v578_v9 = vld [vmem:[%s737_s1 + $0x30] sm:$0xff] (!%p113_p2) }
   0x7   : > { %v147_v6 = vld [vmem:[%s737_s1 + $0x8] sm:$0xff] (!%p113_p2)  ;;  %v638_v7 = vpack.c.bf16 (!%p113_p2), %v573_v4, %v572_v2  ;;  %v579_v10 = vld [vmem:[%s737_s1 + $0x38] sm:$0xff] (!%p113_p2) }
   0x8   : > { %v634_v8 = vpack.c.bf16 (!%p113_p2), %v147_v6, %v146_v5  ;;  %631 = vmatprep.subr.bf16.mxu1 (!%p113_p2), %v630_v3  ;;  %v642_v11 = vpack.c.bf16 (!%p113_p2), %v579_v10, %v578_v9 }
   0x9   : > { %639 = vmatprep.subr.bf16.mxu0 (!%p113_p2), %v638_v7  ;;  %633 = vmatpush3.bf16.msra.mxu1 (!%p113_p2), %v630_v3 }
   0xa   : > { %641 = vmatpush3.bf16.msra.mxu0 (!%p113_p2), %v638_v7  ;;  %635 = vmatprep.subr.bf16.mxu1 (!%p113_p2), %v634_v8 }
   0xb   : > { %643 = vmatprep.subr.bf16.mxu0 (!%p113_p2), %v642_v11 }
   0xd   : > { %s740_s10 = smov (!%p134_p3, %s553_s10), 1 }
   0xe   : > { %s584_s27 = sshll.u32 %s740_s10, 6  ;;  %s585_s3 = sshll.u32 %s740_s10, 4 }
   0xf   : > { %s138_s30 = scalar_lea.vmem %s736_s0, %s584_s27  ;;  %s143_s6 = scalar_lea.vmem %s738_s2, %s585_s3 }
  0x10   : > { %v562_v12 = vld [vmem:[%s138_s30 + $0x10] sm:$0xff]  ;;  %v570_v13 = vld [vmem:[%s138_s30 + $0x20] sm:$0xff]  ;;  %v563_v14 = vld [vmem:[%s138_s30 + $0x18] sm:$0xff] }
  0x11   : > { %606 = vmatprep.mubr.msk.f32.mxu1 %vm154_vm0, %v562_v12  ;;  %620 = vmatprep.mubr.msk.f32.mxu0 %vm154_vm0, %v570_v13  ;;  %v571_v15 = vld [vmem:[%s138_s30 + $0x28] sm:$0xff]  ;;  %v144_v16 = vld [vmem:[%s138_s30] sm:$0xff]  ;;  %v576_v17 = vld [vmem:[%s138_s30 + $0x30] sm:$0xff] }
  0x12   : > { %607 = vmatmul.mubr.msk.f32.vlgmr.msra.gmra.mrb[0].mxu1 %vm154_vm0, %v563_v14  ;;  %621 = vmatmul.mubr.msk.f32.vlgmr.msra.gmra.mrb[0].mxu0 %vm154_vm0, %v571_v15  ;;  %v145_v18 = vld [vmem:[%s138_s30 + $0x8] sm:$0xff]  ;;  %v577_v19 = vld [vmem:[%s138_s30 + $0x38] sm:$0xff] }
  0x13   : > { %637 = vmatpush3.bf16.msra.mxu1 %v634_v8  ;;  %645 = vmatpush3.bf16.msra.mxu0 %v642_v11 }
  0x14   : > { %613 = vmatprep.mubr.msk.f32.mxu1 %vm154_vm0, %v144_v16  ;;  %627 = vmatprep.mubr.msk.f32.mxu0 %vm154_vm0, %v576_v17 }
  0x1a   : > { %614 = vmatmul.mubr.msk.f32.vlgmr.msra.gmra.mrb[0].mxu1 %vm154_vm0, %v145_v18  ;;  %628 = vmatmul.mubr.msk.f32.vlgmr.msra.gmra.mrb[0].mxu0 %vm154_vm0, %v577_v19 }
  0xed   : > { %v615_v20 = vpop.f32.mrb[0].mxu1  ;;  %v629_v21 = vpop.f32.mrb[0].mxu0 }
  0xee   : > { %v646_v22 = vadd.f32 %v629_v21, %v615_v20  ;;  %v308_v23 = vpop.f32.mrb[1].mxu1  ;;  %v484_v24 = vpop.f32.mrb[1].mxu0 }
  0xef   : > { %v647_v25 = vadd.f32 %v484_v24, %v308_v23 }
  0xf0   : > { %497 = vst.msk [vmem:[%s143_s6 + $0x8] sm:$0xff] %vm495_vm1, %v646_v22 }
  0xf1   : > { %496 = vst.msk [vmem:[%s143_s6] sm:$0xff] %vm495_vm1, %v647_v25 }
  0xf2 PF: > { %s12_s9 = sadd.s32 1, %s666_s9  }
  0xf3   : > { %p9_p4 = scmp.ge.s32.totalorder %s12_s9, 4  }
  0xf5   :  { %11 = sbr.rel (!%p9_p4) target bundleno = 1 (0x1), region = 64 }

</bundles_post_ra>
